<compile_context>
chip_gen: v6e
topology: v6e:2x2x1
jax: 0.10.0
libtpu: 0.0.40
codegen_flags: <defaults>
</compile_context>

<pallas_src>
import jax
import jax.numpy as jnp
from jax.experimental import pallas as pl
from jax.experimental.pallas import tpu as pltpu

LANE = 128
BN_EPS = 1e-6


def _vit_head_kernel(x_ref, mu_ref, var_ref, w_ref, b_ref, o_ref):
    # x_ref:  (TB, S, E)  batch tile of tokens (token 0 = CLS)
    # mu_ref: (1, E)      BN running mean        (VMEM-resident)
    # var_ref:(1, E)      BN running var         (VMEM-resident)
    # w_ref:  (E, CP)     weight, transposed + lane-padded (VMEM-resident)
    # b_ref:  (1, CP)     bias, lane-padded      (VMEM-resident)
    # o_ref:  (TB, CP)    lane-dense logits tile
    x = x_ref[...].astype(jnp.float32)
    s = x.shape[1]
    # mean over tokens 1..S-1 == (sum over all tokens - CLS token) / (S - 1)
    pooled = (jnp.sum(x, axis=1) - x[:, 0, :]) * (1.0 / (s - 1))
    # BatchNorm1d(affine=False), inference with running stats.
    inv_std = jax.lax.rsqrt(var_ref[...] + BN_EPS)
    normed = (pooled - mu_ref[...]) * inv_std
    # Linear on the MXU, f32 accumulation, bias add on the VPU.
    acc = jnp.dot(normed, w_ref[...], preferred_element_type=jnp.float32)
    o_ref[...] = (acc + b_ref[...]).astype(o_ref.dtype)


def classifier_vit(x, running_mean, running_var, w, b, *, block_b=512):
    """x: (B, S, E); running_mean/var: (E,); w: (C, E) PyTorch layout; b: (C,)."""
    B, S, E = x.shape
    C = w.shape[0]
    CP = ((C + LANE - 1) // LANE) * LANE  # lane-dense output width (>= 128)

    # Pre-transpose + zero-pad weight/bias so the kernel writes a 128-wide slab.
    w_t = jnp.pad(w.T.astype(jnp.float32), ((0, 0), (0, CP - C)))
    b_p = jnp.pad(b.astype(jnp.float32).reshape(1, C), ((0, 0), (0, CP - C)))
    mu = running_mean.reshape(1, E).astype(jnp.float32)
    var = running_var.reshape(1, E).astype(jnp.float32)

    tb = min(block_b, B)
    grid = (pl.cdiv(B, tb),)

    out = pl.pallas_call(
        _vit_head_kernel,
        out_shape=jax.ShapeDtypeStruct((B, CP), jnp.float32),
        grid=grid,
        in_specs=[
            pl.BlockSpec((tb, S, E), lambda i: (i, 0, 0)),  # streamed batch tiles
            pl.BlockSpec((1, E), lambda i: (0, 0)),         # resident BN mean
            pl.BlockSpec((1, E), lambda i: (0, 0)),         # resident BN var
            pl.BlockSpec((E, CP), lambda i: (0, 0)),        # resident weight
            pl.BlockSpec((1, CP), lambda i: (0, 0)),        # resident bias
        ],
        out_specs=pl.BlockSpec((tb, CP), lambda i: (i, 0)),
        compiler_params=pltpu.CompilerParams(
            dimension_semantics=("parallel",),  # shard batch tiles across TCs (v7x)
        ),
        cost_estimate=pl.CostEstimate(
            flops=2 * B * E * CP + B * S * E,
            bytes_accessed=4 * (B * S * E + E * CP + B * CP + 2 * E + CP),
            transcendentals=0,
        ),
    )(x, mu, var, w_t, b_p)
    return out[:, :C]


def init_params(key, embed_dim, num_classes):
    # nn.Linear default init: U(-1/sqrt(in), 1/sqrt(in)); BN running stats.
    k_w, k_b, k_m, k_v = jax.random.split(key, 4)
    bound = 1.0 / (embed_dim ** 0.5)
    w = jax.random.uniform(k_w, (num_classes, embed_dim), jnp.float32,
                           minval=-bound, maxval=bound)
    b = jax.random.uniform(k_b, (num_classes,), jnp.float32,
                           minval=-bound, maxval=bound)
    running_mean = 0.1 * jax.random.normal(k_m, (embed_dim,), jnp.float32)
    running_var = jax.random.uniform(k_v, (embed_dim,), jnp.float32,
                                     minval=0.5, maxval=1.5)
    return running_mean, running_var, w, b


if __name__ == "__main__":
    key = jax.random.PRNGKey(0)
    k_x, k_p = jax.random.split(key)

    B, S, E, C = 16, 8, 32, 10  # batch, tokens (incl. CLS), embed_dim, classes
    x = jax.random.normal(k_x, (B, S, E), jnp.float32)
    running_mean, running_var, w, b = init_params(k_p, E, C)

    out = classifier_vit(x, running_mean, running_var, w, b, block_b=8)
    out = jax.block_until_ready(out)

    # Pure-JAX reference with identical semantics (eval-mode BN).
    pooled = x[:, 1:, :].mean(axis=1)
    normed = (pooled - running_mean) / jnp.sqrt(running_var + BN_EPS)
    ref = normed @ w.T + b

    assert out.shape == (B, C)
    assert jnp.allclose(out, ref, atol=1e-5, rtol=1e-5), float(
        jnp.max(jnp.abs(out - ref)))

    print("KERNEL_OK")
</pallas_src>

<mosaic_0001>
module attributes {stable_mosaic.version = 11 : i64} {
  func.func @_vit_head_kernel(%arg0: i32, %arg1: memref<8x8x32xf32, #tpu.memory_space<vmem>>, %arg2: memref<1x32xf32, #tpu.memory_space<vmem>>, %arg3: memref<1x32xf32, #tpu.memory_space<vmem>>, %arg4: memref<32x128xf32, #tpu.memory_space<vmem>>, %arg5: memref<1x128xf32, #tpu.memory_space<vmem>>, %arg6: memref<8x128xf32, #tpu.memory_space<vmem>>) attributes {dimension_semantics = [#tpu.dimension_semantics<parallel>], iteration_bounds = array<i64: 2>, scalar_prefetch = 0 : i64, scratch_operands = 0 : i64, tpu.core_type = #tpu.core_type<tc>, window_params = [{transform_indices = @transform_0, window_bounds = array<i64: 8, 8, 32>}, {pipeline_mode = #tpu.pipeline_mode<synchronous>, transform_indices = @transform_1, window_bounds = array<i64: 1, 32>}, {pipeline_mode = #tpu.pipeline_mode<synchronous>, transform_indices = @transform_2, window_bounds = array<i64: 1, 32>}, {pipeline_mode = #tpu.pipeline_mode<synchronous>, transform_indices = @transform_3, window_bounds = array<i64: 32, 128>}, {pipeline_mode = #tpu.pipeline_mode<synchronous>, transform_indices = @transform_4, window_bounds = array<i64: 1, 128>}, {transform_indices = @transform_5, window_bounds = array<i64: 8, 128>}]} {
    %c0 = arith.constant 0 : index
    %c0_0 = arith.constant 0 : index
    %c0_1 = arith.constant 0 : index
    %0 = vector.load %arg1[%c0, %c0_0, %c0_1] : memref<8x8x32xf32, #tpu.memory_space<vmem>>, vector<8x8x32xf32>
    %cst = arith.constant dense<0.000000e+00> : vector<8x32xf32>
    %1 = vector.multi_reduction <add>, %0, %cst [1] : vector<8x8x32xf32> to vector<8x32xf32>
    %2 = vector.extract_strided_slice %0 {offsets = [0, 0, 0], sizes = [8, 1, 32], strides = [1, 1, 1]} : vector<8x8x32xf32> to vector<8x1x32xf32>
    %3 = vector.shape_cast %2 : vector<8x1x32xf32> to vector<8x32xf32>
    %4 = arith.subf %1, %3 : vector<8x32xf32>
    %cst_2 = arith.constant 0.142857149 : f32
    %5 = vector.broadcast %cst_2 : f32 to vector<8x32xf32>
    %6 = arith.mulf %4, %5 : vector<8x32xf32>
    %c0_3 = arith.constant 0 : index
    %c0_4 = arith.constant 0 : index
    %7 = vector.load %arg3[%c0_3, %c0_4] : memref<1x32xf32, #tpu.memory_space<vmem>>, vector<1x32xf32>
    %cst_5 = arith.constant 9.99999997E-7 : f32
    %8 = vector.broadcast %cst_5 : f32 to vector<1x32xf32>
    %9 = arith.addf %7, %8 : vector<1x32xf32>
    %10 = math.rsqrt %9 : vector<1x32xf32>
    %c0_6 = arith.constant 0 : index
    %c0_7 = arith.constant 0 : index
    %11 = vector.load %arg2[%c0_6, %c0_7] : memref<1x32xf32, #tpu.memory_space<vmem>>, vector<1x32xf32>
    %12 = vector.broadcast %11 : vector<1x32xf32> to vector<8x32xf32>
    %13 = arith.subf %6, %12 : vector<8x32xf32>
    %14 = vector.broadcast %10 : vector<1x32xf32> to vector<8x32xf32>
    %15 = arith.mulf %13, %14 : vector<8x32xf32>
    %c0_8 = arith.constant 0 : index
    %c0_9 = arith.constant 0 : index
    %16 = vector.load %arg4[%c0_8, %c0_9] : memref<32x128xf32, #tpu.memory_space<vmem>>, vector<32x128xf32>
    %cst_10 = arith.constant dense<0.000000e+00> : vector<8x128xf32>
    %17 = tpu.matmul %15, %16, %cst_10 {dimension_numbers = #tpu.dot_dimension_numbers<[1], [0], [0], [1], [0, 0, 1, 1], [], []>} : vector<8x32xf32>, vector<32x128xf32>, vector<8x128xf32> -> vector<8x128xf32>
    %c0_11 = arith.constant 0 : index
    %c0_12 = arith.constant 0 : index
    %18 = vector.load %arg5[%c0_11, %c0_12] : memref<1x128xf32, #tpu.memory_space<vmem>>, vector<1x128xf32>
    %19 = vector.broadcast %18 : vector<1x128xf32> to vector<8x128xf32>
    %20 = arith.addf %17, %19 : vector<8x128xf32>
    %c0_13 = arith.constant 0 : index
    %c0_14 = arith.constant 0 : index
    %21 = vector.load %arg6[%c0_13, %c0_14] : memref<8x128xf32, #tpu.memory_space<vmem>>, vector<8x128xf32>
    tpu.vector_store %arg6[%c0_13, %c0_14], %20 {strides = array<i32>} : memref<8x128xf32, #tpu.memory_space<vmem>>, vector<8x128xf32>,
    return
  }
  func.func @transform_0(%arg0: i32) -> (i32, i32, i32) {
    %c0_i32 = arith.constant 0 : i32
    %c0_i32_0 = arith.constant 0 : i32
    %c0_i32_1 = arith.constant 0 : i32
    return %arg0, %c0_i32, %c0_i32_0 : i32, i32, i32
  }
  func.func @transform_1(%arg0: i32) -> (i32, i32) {
    %c0_i32 = arith.constant 0 : i32
    %c0_i32_0 = arith.constant 0 : i32
    %c0_i32_1 = arith.constant 0 : i32
    return %c0_i32, %c0_i32_0 : i32, i32
  }
  func.func @transform_2(%arg0: i32) -> (i32, i32) {
    %c0_i32 = arith.constant 0 : i32
    %c0_i32_0 = arith.constant 0 : i32
    %c0_i32_1 = arith.constant 0 : i32
    return %c0_i32, %c0_i32_0 : i32, i32
  }
  func.func @transform_3(%arg0: i32) -> (i32, i32) {
    %c0_i32 = arith.constant 0 : i32
    %c0_i32_0 = arith.constant 0 : i32
    %c0_i32_1 = arith.constant 0 : i32
    return %c0_i32, %c0_i32_0 : i32, i32
  }
  func.func @transform_4(%arg0: i32) -> (i32, i32) {
    %c0_i32 = arith.constant 0 : i32
    %c0_i32_0 = arith.constant 0 : i32
    %c0_i32_1 = arith.constant 0 : i32
    return %c0_i32, %c0_i32_0 : i32, i32
  }
  func.func @transform_5(%arg0: i32) -> (i32, i32) {
    %c0_i32 = arith.constant 0 : i32
    %c0_i32_0 = arith.constant 0 : i32
    return %arg0, %c0_i32 : i32, i32
  }
}

</mosaic_0001>

<bundles_post_ra>
// kernel: tpu_custom_call.1
= control target key start
LH: loop header
LB: loop body
LE: loop exit
PB: predicated region body
PF: predicated region fallthrough
CT: control target
= control target key end

     0   :  { %10 = vsyncpa [#allocation3], 0  ;;  %s1064_s0 = inlined_call_operand.hbm [shape: f32[16,8,32], index: 0, kind: input, shape index: {}]   ;;  %s1065_s1 = inlined_call_operand.vmem [shape: f32[1,32], index: 1, kind: input, shape index: {}]   ;;  %s1066_s2 = inlined_call_operand.vmem [shape: f32[1,32], index: 2, kind: input, shape index: {}]   ;;  %s1067_s3 = inlined_call_operand.hbm [shape: f32[32,128], index: 3, kind: input, shape index: {}]   ;;  %s1068_s4 = inlined_call_operand.vmem [shape: f32[1,128], index: 4, kind: input, shape index: {}]   ;;  %s1069_s5 = inlined_call_operand.hbm [shape: f32[16,128], index: 5, kind: output, shape index: {}]  }
   0x1   :  { %12 = vsyncpa [#allocation3 + $0x1], 0 }
   0x2   :  { %13 = vsyncpa [#allocation6], 0 }
   0x3   :  { %14 = vsyncpa [#allocation4], 0 }
   0x4   :  { %16 = vsyncpa [#allocation4 + $0x1], 0  ;;  %s838_s18 = smov 0   ;;  %s840_s19 = smov 0  }
   0x5   :  { %s842_s20 = smov 0   ;;  %s844_s21 = smov 0  }
   0x6 LB: > { %s859_s22 = sadd.s32 4294967295, %s799_s21   ;;  %s579_s23 = sadd.s32 4294967294, %s799_s21   ;;  %s799_s21 = sphi %s844_s21, %s1093_s21   ;;  %s795_s20 = sphi %s842_s20, %s1092_s20   ;;  %s791_s19 = sphi %s840_s19, %s1091_s19   ;;  %s787_s18 = sphi %s838_s18, %s1090_s18  }
   0x7   : > { %p42_p0 = scmp.ne.s32.totalorder %s791_s19, %s787_s18  ;;  %p1070_p1 = scmp.eq.s32.totalorder %s859_s22, 0 }
   0x8   : > { %p156_p3 = scmp.eq.s32.totalorder %s579_s23, 1  ;;  %p580_p5 = scmp.ge.s32.totalorder %s799_s21, 1 }
   0x9   : > { %p868_p4 = por %p1070_p1, %p42_p0  ;;  %p163_p7 = scmp.lt.s32.totalorder %s799_s21, 3 }
   0xa   : > { %p873_p6 = por %p156_p3, %p42_p0  ;;  %s801_s27 = smov [#allocation5]  }
   0xb   : > { %s1075_s24 = scalar_select %p868_p4, 1, 0 }
   0xc   : > { %s1076_s25 = scalar_select %p873_p6, 1, 0 }
   0xd   : > { %p878_p8 = pnand %p580_p5, %p163_p7  ;;  %s181_s28 = sshll.u32 %s801_s27, 4  ;;  %s182_s28 = int_to_ptr.vmem [resolvable:$true] %s181_s28 }
   0xe   : > { %s892_s30 = sadd.s32 1, %s799_s21   ;;  %s29_s6 = sadd.s32 1, %s795_s20 }
   0xf   : > { %s1077_s26 = scalar_select %p878_p8, 1, 0 }
  0x10   : > { %p622_p9 = pneg %p878_p8  ;;  %s26_s7 = ssub.s32 %s799_s21, %s892_s30 }
  0x11   : > { %s688_s8 = scalar_lea.vmem %s182_s28, 512  ;;  %p696_p5 = scmp.lt.s32.totalorder %s182_s28, %s182_s28 }
  0x12   : > { %p887_p11 = pnand %p622_p9, %p1070_p1  ;;  %p689_p13 = scmp.ne.s32.totalorder %s182_s28, %s688_s8 }
  0x13   : > { %p697_p7 = scmp.lt.s32.totalorder %s688_s8, %s688_s8 }
  0x14   : > { %p679_p12 = pneg %p887_p11 }
  0x15   : > { %p698_p10 = por %p697_p7, %p696_p5 }
  0x16   : > { %p691_p0 = pnand %p689_p13, %p679_p12 }
  0x18   : > { %p692_p3 = pneg %p691_p0 }
  0x1a   : > { %p699_p2 = pnand %p698_p10, %p692_p3 }
  0x1c   : > { %702 = shalt.err (!%p699_p2)
}
  0x1d   : > { %s1071_s9 = smov 128   ;;  %s803_s10 = smov 8  }
  0x1e   : > { %625 = dma.hbm_to_vmem [thread:$0]  (!%p887_p11), %s1067_s3, 512, %s182_s28, [#allocation6], %s1071_s9, %s1071_s9, %s803_s10  }
  0x1f   : > { %p27_p2 = scmp.eq.s32.totalorder %s26_s7, 0  ;;  %p36_p9 = scmp.ne.s32.totalorder %s795_s20, %s791_s19 }
  0x20   : > { %p37_p10 = scmp.eq.s32.totalorder %s799_s21, 0  ;;  %p635_p12 = scmp.lt.s32.totalorder %s799_s21, 2 }
  0x21   : > { %s912_s13 = scalar_select %p27_p2, %s795_s20, %s29_s6  }
  0x22   : > { %p38_p13 = por %p37_p10, %p36_p9  ;;  %p1079_p0 = scmp.eq.s32.totalorder %s859_s22, 1 }
  0x23   : > { %s198_s15 = sand.u32 1, %s795_s20   ;;  %s597_s16 = sshll.u32 %s799_s21, 10 }
  0x24   : > { %p916_p3 = por %p1079_p0, %p36_p9  ;;  %s583_s17 = sshll.u32 %s198_s15, 6 }
  0x25   : > { %s925_s29 = scalar_lea.hbm %s1064_s0, %s597_s16  ;;  %s202_s28 = scalar_lea.vmem [#allocation2], %s583_s17 }
  0x26   : > { %s1080_s14 = scalar_select %p916_p3, 1, 0 }
  0x27   : > { %s209_s6 = sshll.u32 %s202_s28, 4  ;;  %p927_p11 = pnand %p635_p12, %p38_p13  ;;  %s931_s6 = int_to_ptr.vmem [resolvable:$true] %s209_s6 }
  0x28   : > { %s933_s8 = scalar_lea.sflag [#allocation3], %s198_s15  ;;  %s703_s11 = scalar_lea.hbm %s925_s29, 1024 }
  0x29   : > { %p704_p5 = scmp.ne.s32.totalorder %s925_s29, %s703_s11  ;;  %p705_p7 = pneg %p927_p11 }
  0x2a   : > { %s708_s17 = scalar_lea.hbm %s1064_s0, 2048  ;;  %p709_p10 = scmp.lt.s32.totalorder %s925_s29, %s1064_s0 }
  0x2b   : > { %p706_p2 = pnand %p705_p7, %p704_p5  ;;  %p710_p12 = scmp.lt.s32.totalorder %s708_s17, %s703_s11 }
  0x2d   : > { %p707_p9 = pneg %p706_p2  ;;  %p711_p13 = por %p710_p12, %p709_p10 }
  0x2f   : > { %p712_p0 = pnand %p711_p13, %p707_p9 }
  0x31   : > { %715 = shalt.err (!%p712_p0)
}
  0x32   : > { %s716_s15 = scalar_lea.vmem %s931_s6, 1024  ;;  %s804_s28 = smov [#allocation2]  }
  0x33   : > { %p717_p1 = scmp.ne.s32.totalorder %s931_s6, %s716_s15  ;;  %s721_s9 = sshll.u32 %s804_s28, 4  ;;  %s722_s9 = int_to_ptr.vmem [resolvable:$false] %s721_s9 }
  0x34   : > { %s723_s12 = scalar_lea.vmem %s722_s9, 2048  ;;  %p724_p2 = scmp.lt.s32.totalorder %s931_s6, %s722_s9 }
  0x35   : > { %p719_p6 = pnand %p717_p1, %p705_p7  ;;  %p725_p3 = scmp.lt.s32.totalorder %s723_s12, %s716_s15 }
  0x37   : > { %p720_p5 = pneg %p719_p6  ;;  %p726_p4 = por %p725_p3, %p724_p2 }
  0x39   : > { %p727_p8 = pnand %p726_p4, %p720_p5 }
  0x3b   : > { %730 = shalt.err (!%p727_p8)
}
  0x3c   : > { %s1082_s11 = smov 128   ;;  %p1083_p1 = scmp.ne.s32.totalorder %s1077_s26, 0 }
  0x3d   : > { %629 = dma.hbm_to_vmem [thread:$0]  (!%p927_p11), %s925_s29, 1024, %s931_s6, %s933_s8, %s1082_s11, %s1082_s11, %s803_s10  }
  0x3e   : > { %221 = sbr.rel (%p1083_p1) target bundleno = 321 (0x141), region = 40  ;;  %s960_s16 = sand.u32 (!%p1083_p1), 1, %s791_s19  }
  0x3f   : > { %s587_s9 = sshll.u32 (!%p1083_p1), %s960_s16, 6  ;;  %s224_s17 = scalar_lea.sflag (!%p1083_p1), [#allocation3], %s960_s16 }
  0x40   : > { %s227_s23 = scalar_lea.vmem (!%p1083_p1), [#allocation2], %s587_s9  ;;  %p1084_p4 = scmp.ne.s32.totalorder (!%p1083_p1), %s1075_s24, 0 }
  0x43   : > { %774 = dma.done.wait (%p1084_p4), %s224_s17, 1024  }
  0x44   : > { %776 = vsyncadd (%p1084_p4), %s224_s17, 4294966272  ;;  %p1085_p6 = scmp.eq.s32.totalorder %s859_s22, 0 }
  0x46   : > { %778 = dma.done.wait (%p1085_p6), [#allocation6], 512   ;;  %p1086_p8 = pmov %p1085_p6 }
  0x47   : > { %v805_v0 = vmov 0.0   ;;  %vm806_vm0 = vmmov 0   ;;  %vm267_vm1 = vcmask 261120   ;;  %v375_v1 = vld [vmem:[#allocation5 + $0x18] sm:$0xff]  ;;  %v374_v2 = vld [vmem:[#allocation5 + $0x10] sm:$0xff]  ;;  %v373_v3 = vld [vmem:[#allocation5 + $0x8] sm:$0xff] }
  0x48   : > { %780 = vsyncadd (%p1086_p8), [#allocation6], 4294966784  ;;  %603 = vmatprep.subr.mxu0 %v805_v0  ;;  %611 = vmatprep.mubr.msk.f32.mxu0 %vm806_vm0, %v805_v0  ;;  %v972_v4 = vld [vmem:[%s227_s23] sm:$0xff]  ;;  %v974_v5 = vld [vmem:[%s227_s23 + $0x8] sm:$0xff]  ;;  %vm392_vm2 = vcmask 1041409   ;;  %vm395_vm3 = vcmask 1042434  }
  0x49   : > { %604 = vmatpush3.msra.mxu0 %v375_v1  ;;  %v976_v6 = vld [vmem:[%s227_s23 + $0x10] sm:$0xff]  ;;  %v978_v7 = vld [vmem:[%s227_s23 + $0x18] sm:$0xff]  ;;  %v980_v8 = vld [vmem:[%s227_s23 + $0x20] sm:$0xff]  ;;  %v268_v9 = vsel %vm267_vm1, %v972_v4, 0.0  ;;  %v275_v10 = vsel %vm267_vm1, %v974_v5, 0.0  ;;  %vm398_vm4 = vcmask 1043459  }
  0x4a   : > { %605 = vmatprep.subr.mxu0 %v805_v0  ;;  %v986_v11 = vld [vmem:[%s227_s23 + $0x28] sm:$0xff]  ;;  %v988_v12 = vld [vmem:[%s227_s23 + $0x30] sm:$0xff]  ;;  %v990_v13 = vld [vmem:[%s227_s23 + $0x38] sm:$0xff]  ;;  %v269_v14 = vrot.slane %v268_v9, 4  ;;  %v276_v15 = vrot.slane %v275_v10, 4  ;;  %v282_v16 = vsel %vm267_vm1, %v976_v6, 0.0 }
  0x4b   : > { %606 = vmatpush3.msra.mxu0 %v374_v2  ;;  %v372_v17 = vld [vmem:[#allocation5] sm:$0xff]  ;;  %v283_v18 = vrot.slane %v282_v16, 4  ;;  %v289_v19 = vsel %vm267_vm1, %v978_v7, 0.0  ;;  %v296_v20 = vsel %vm267_vm1, %v980_v8, 0.0  ;;  %v303_v21 = vsel %vm267_vm1, %v986_v11, 0.0  ;;  %s589_s6 = sshll.u32 %s960_s16, 3 }
  0x4c   : > { %607 = vmatprep.subr.mxu0 %v805_v0  ;;  %v270_v22 = vadd.f32 %v269_v14, %v268_v9  ;;  %v277_v23 = vadd.f32 %v276_v15, %v275_v10  ;;  %v290_v24 = vrot.slane %v289_v19, 4  ;;  %v297_v25 = vrot.slane %v296_v20, 4  ;;  %v340_v54 = vld [vmem:[%s1066_s2] sm:$0x1]  ;;  %s594_s27 = sshll.u32 %s859_s22, 7  ;;  %s257_s15 = scalar_lea.vmem [#allocation7], %s589_s6 }
  0x4d   : > { %608 = vmatpush3.msra.mxu0 %v373_v3  ;;  %v284_v26 = vadd.f32 %v283_v18, %v282_v16  ;;  %v304_v27 = vrot.slane %v303_v21, 4  ;;  %v310_v28 = vsel %vm267_vm1, %v988_v12, 0.0  ;;  %v317_v29 = vsel %vm267_vm1, %v990_v13, 0.0  ;;  %s499_s28 = sshll.u32 %s257_s15, 4  ;;  %s1027_s9 = scalar_lea.hbm %s1069_s5, %s594_s27  ;;  %s500_s28 = int_to_ptr.vmem [resolvable:$true] %s499_s28 }
  0x4e   : > { %609 = vmatprep.subr.mxu0 %v805_v0  ;;  %v291_v30 = vadd.f32 %v290_v24, %v289_v19  ;;  %v298_v31 = vadd.f32 %v297_v25, %v296_v20  ;;  %v271_v32 = vrot.slane %v270_v22, 2  ;;  %v311_v34 = vrot.slane %v310_v28, 4  ;;  %s486_s17 = scalar_lea.sflag [#allocation4], %s960_s16  ;;  %s731_s23 = scalar_lea.vmem %s500_s28, 128 }
  0x4f   : > { %610 = vmatpush3.msra.mxu0 %v372_v17  ;;  %v305_v33 = vadd.f32 %v304_v27, %v303_v21  ;;  %v318_v35 = vrot.slane %v317_v29, 4  ;;  %v278_v36 = vrot.slane %v277_v23, 2  ;;  %v285_v37 = vrot.slane %v284_v26, 2  ;;  %p732_p3 = scmp.ne.s32.totalorder %s500_s28, %s731_s23  ;;  %p1087_p11 = scmp.ne.s32.totalorder %s1080_s14, 0 }
  0x50   : > { %v292_v38 = vrot.slane %v291_v30, 2  ;;  %v299_v39 = vrot.slane %v298_v31, 2  ;;  %v312_v41 = vadd.f32 %v311_v34, %v310_v28  ;;  %v272_v43 = vadd.f32 %v271_v32, %v270_v22  ;;  %s807_s24 = smov [#allocation7]  }
  0x51   : > { %v306_v40 = vrot.slane %v305_v33, 2  ;;  %v319_v42 = vadd.f32 %v318_v35, %v317_v29  ;;  %v279_v46 = vadd.f32 %v278_v36, %v277_v23  ;;  %v286_v47 = vadd.f32 %v285_v37, %v284_v26  ;;  %p733_p7 = pnand %p732_p3, %p1087_p11  ;;  %s735_s22 = sshll.u32 %s807_s24, 4  ;;  %s736_s22 = int_to_ptr.vmem [resolvable:$false] %s735_s22 }
  0x52   : > { %v313_v44 = vrot.slane %v312_v41, 2  ;;  %v293_v48 = vadd.f32 %v292_v38, %v291_v30  ;;  %v300_v49 = vadd.f32 %v299_v39, %v298_v31  ;;  %v273_v53 = vrot.slane %v272_v43, 1  ;;  %s737_s26 = scalar_lea.vmem %s736_s22, 256  ;;  %p738_p10 = scmp.lt.s32.totalorder %s500_s28, %s736_s22 }
  0x53   : > { %v320_v45 = vrot.slane %v319_v42, 2  ;;  %v307_v50 = vadd.f32 %v306_v40, %v305_v33  ;;  %v280_v55 = vrot.slane %v279_v46, 1  ;;  %v287_v56 = vrot.slane %v286_v47, 1  ;;  %p734_p9 = pneg %p733_p7  ;;  %p739_p12 = scmp.lt.s32.totalorder %s737_s26, %s731_s23 }
  0x54   : > { %v314_v51 = vadd.f32 %v313_v44, %v312_v41  ;;  %v294_v57 = vrot.slane %v293_v48, 1  ;;  %v301_v58 = vrot.slane %v300_v49, 1  ;;  %v341_v62 = vadd.f32 1e-06, %v340_v54 }
  0x55   : > { %v321_v52 = vadd.f32 %v320_v45, %v319_v42  ;;  %v308_v59 = vrot.slane %v307_v50, 1  ;;  %v274_v63 = vadd.f32 %v273_v53, %v272_v43  ;;  %v281_v0 = vadd.f32 %v280_v55, %v279_v46  ;;  %p740_p13 = por %p739_p12, %p738_p10 }
  0x56   : > { %v315_v60 = vrot.slane %v314_v51, 1  ;;  %v288_v1 = vadd.f32 %v287_v56, %v286_v47  ;;  %v295_v2 = vadd.f32 %v294_v57, %v293_v48  ;;  %675 = vrsqrt.f32 %v341_v62 }
  0x57   : > { %v322_v61 = vrot.slane %v321_v52, 1  ;;  %v302_v3 = vadd.f32 %v301_v58, %v300_v49  ;;  %v309_v9 = vadd.f32 %v308_v59, %v307_v50  ;;  %v359_v15 = vlaneseq  ;;  %v591_v59 = vld [vmem:[%s1068_s4] ss:$0 sm:$0xff]  ;;  %p741_p0 = pnand %p740_p13, %p734_p9 }
  0x58   : > { %v316_v10 = vadd.f32 %v315_v60, %v314_v51  ;;  %v324_v16 = vsub.f32 %v274_v63, %v972_v4  ;;  %v325_v17 = vsub.f32 %v281_v0, %v974_v5  ;;  %v326_v18 = vsub.f32 %v288_v1, %v976_v6  ;;  %v590_v4 = vld [vmem:[%s1065_s1] ss:$0 sm:$0xff] }
  0x59   : > { %v323_v14 = vadd.f32 %v322_v61, %v321_v52  ;;  %v327_v19 = vsub.f32 %v295_v2, %v978_v7  ;;  %v328_v20 = vsub.f32 %v302_v3, %v980_v8  ;;  %v329_v21 = vsub.f32 %v309_v9, %v986_v11 }
  0x5a   : > { %v330_v22 = vsub.f32 %v316_v10, %v988_v12  ;;  %v360_v24 = vshrl.u32 %v359_v15, 7  ;;  %v332_v25 = vmul.f32 0.14285715, %v324_v16  ;;  %v333_v26 = vmul.f32 0.14285715, %v325_v17 }
  0x5b   : > { %v331_v23 = vsub.f32 %v323_v14, %v990_v13  ;;  %v334_v5 = vmul.f32 0.14285715, %v326_v18  ;;  %v335_v27 = vmul.f32 0.14285715, %v327_v19  ;;  %v336_v6 = vmul.f32 0.14285715, %v328_v20 }
  0x5c   : > { %v337_v28 = vmul.f32 0.14285715, %v329_v21  ;;  %v338_v7 = vmul.f32 0.14285715, %v330_v22  ;;  %v361_v8 = vsub.s32 0, %v360_v24  ;;  %v350_v30 = vsub.f32 %v332_v25, %v590_v4 }
  0x5d   : > { %v339_v29 = vmul.f32 0.14285715, %v331_v23  ;;  %v351_v11 = vsub.f32 %v333_v26, %v590_v4  ;;  %v352_v31 = vsub.f32 %v334_v5, %v590_v4  ;;  %v353_v12 = vsub.f32 %v335_v27, %v590_v4 }
  0x5e   : > { %v354_v13 = vsub.f32 %v336_v6, %v590_v4  ;;  %v355_v33 = vsub.f32 %v337_v28, %v590_v4  ;;  %v356_v34 = vsub.f32 %v338_v7, %v590_v4  ;;  %vm401_vm5 = vcmask 1044484  }
  0x5f   : > { %v357_v35 = vsub.f32 %v339_v29, %v590_v4  ;;  %vm404_vm6 = vcmask 1045509   ;;  %vm407_vm7 = vcmask 1046534   ;;  %vm410_vm8 = vcmask 1047559  }
  0x63   : > { %v676_v32 = vpop.eup %675 }
  0x64   : > { %v362_v36 = vrot.slane %v676_v32, %v361_v8 }
  0x66   : > { %v364_v37 = vmul.f32 %v362_v36, %v350_v30  ;;  %v365_v38 = vmul.f32 %v362_v36, %v351_v11  ;;  %v366_v39 = vmul.f32 %v362_v36, %v352_v31  ;;  %v367_v40 = vmul.f32 %v362_v36, %v353_v12 }
  0x67   : > { %v368_v41 = vmul.f32 %v362_v36, %v354_v13  ;;  %v369_v42 = vmul.f32 %v362_v36, %v355_v33  ;;  %v370_v43 = vmul.f32 %v362_v36, %v356_v34  ;;  %v371_v44 = vmul.f32 %v362_v36, %v357_v35 }
  0x68   : > { %v391_v45 = vrot.slane %v365_v38, 7  ;;  %v394_v46 = vrot.slane %v366_v39, 6  ;;  %v397_v47 = vrot.slane %v367_v40, 5 }
  0x69   : > { %v400_v48 = vrot.slane %v368_v41, 4  ;;  %v403_v50 = vrot.slane %v369_v42, 3  ;;  %v406_v52 = vrot.slane %v370_v43, 2  ;;  %v409_v54 = vrot.slane %v371_v44, 1 }
  0x6a   : > { %v393_v49 = vsel %vm392_vm2, %v391_v45, %v364_v37 }
  0x6b   : > { %v396_v51 = vsel %vm395_vm3, %v394_v46, %v393_v49 }
  0x6c   : > { %v399_v53 = vsel %vm398_vm4, %v397_v47, %v396_v51 }
  0x6d   : > { %v402_v55 = vsel %vm401_vm5, %v400_v48, %v399_v53 }
  0x6e   : > { %v405_v56 = vsel %vm404_vm6, %v403_v50, %v402_v55 }
  0x6f   : > { %v408_v57 = vsel %vm407_vm7, %v406_v52, %v405_v56 }
  0x70   : > { %v411_v58 = vsel %vm410_vm8, %v409_v54, %v408_v57 }
  0x71   : > { %612 = vmatmul.mubr.msk.f32.vlgmr.msra.gmra.mxu0 %vm267_vm1, %v411_v58 }
 0x131   : > { %v480_v60 = vpop.f32.mrf.mxu0 }
 0x132   : > { %v481_v61 = vadd.f32 %v591_v59, %v480_v60 }
 0x133   : > { %v613_v62 = vpop.f32.mrf.mxu0 }
 0x134   : > { %484 = vst [vmem:[%s257_s15] sm:$0xff] %v481_v61 }
 0x135   : > { %744 = shalt.err (!%p741_p0)
}
 0x136   : > { %s745_s10 = scalar_lea.hbm %s1027_s9, 128  ;;  %s749_s6 = scalar_lea.hbm %s1069_s5, 256 }
 0x137   : > { %p746_p5 = scmp.ne.s32.totalorder %s1027_s9, %s745_s10  ;;  %p750_p4 = scmp.lt.s32.totalorder %s1027_s9, %s1069_s5 }
 0x138   : > { %p751_p6 = scmp.lt.s32.totalorder %s749_s6, %s745_s10 }
 0x139   : > { %p747_p2 = pnand %p746_p5, %p1087_p11 }
 0x13a   : > { %p752_p8 = por %p751_p6, %p750_p4 }
 0x13b   : > { %p748_p1 = pneg %p747_p2 }
 0x13d   : > { %p753_p3 = pnand %p752_p8, %p748_p1 }
 0x13f   : > { %756 = shalt.err (!%p753_p3)
}
 0x140   : > { %620 = dma.vmem_to_hbm [thread:$0]  (%p1087_p11), %s500_s28, 128, %s1027_s9, %s486_s17  }
 0x141 PF: > { %s511_s27 = sand.u32 1, %s787_s18   ;;  %p1088_p7 = scmp.ne.s32.totalorder %s1076_s25, 0 }
 0x142   : > { %p1089_p9 = scmp.ge.s32.totalorder %s799_s21, 2  ;;  %s512_s15 = scalar_lea.sflag [#allocation4], %s511_s27 }
 0x144   : > { %p631_p10 = pnand %p1089_p9, %p1088_p7 }
 0x146   : > { %p632_p12 = pneg %p631_p10 }
 0x148   : > { %782 = dma.done.wait (%p632_p12), %s512_s15, 128  }
 0x149   : > { %784 = vsyncadd (%p632_p12), %s512_s15, 4294967168  ;;  %p19_p13 = scmp.ge.s32.totalorder %s892_s30, 4   ;;  %s1090_s18 = smov %s791_s19 }
 0x14a   : > { %s1091_s19 = smov %s795_s20  ;;  %s1092_s20 = smov %s912_s13 }
 0x14b   : > { %s1093_s21 = smov %s892_s30  ;;  %21 = sbr.rel (!%p19_p13) target bundleno = 6 (0x6), region = 89 }
 0x150   :  { %517 = vsyncpa [#allocation3], 1 }
 0x151   :  { %519 = vsyncpa [#allocation3 + $0x1], 1 }
 0x152   :  { %520 = vsyncpa [#allocation6], 1 }
 0x153   :  { %521 = vsyncpa [#allocation4], 1 }
 0x154   :  { %523 = vsyncpa [#allocation4 + $0x1], 1 }

</bundles_post_ra>
